<compile_context>
chip_gen: v5e
topology: v5e:2x2
jax: 0.10.0
libtpu: 0.0.40
codegen_flags: <defaults>
</compile_context>

<pallas_src>
import functools

import jax
import jax.numpy as jnp
from jax.experimental import pallas as pl
from jax.experimental.pallas import tpu as pltpu

LANE = 128     # f32 lane width
SUBLANE = 8    # f32 sublane count


def _round_up(x, m):
    return (x + m - 1) // m * m


def _mlp_kernel(x_ref, w1_ref, w2_ref, w3_ref, w4_ref, b_ref, o_ref, *, splits):
    """One batch tile through the whole 4-layer MLP.

    x_ref : [tile_b, pad_in]      (zero-padded input features)
    wN_ref: [pad_in_N, pad_out_N] (pre-transposed, zero-padded weights)
    b_ref : [1, sum(pad_out_N)]   (all 4 biases packed along lanes)
    o_ref : [tile_b, pad_out_4]
    """
    s1, s2, s3, s4 = splits

    h = x_ref[...]  # already f32; no cast needed

    h = jnp.dot(h, w1_ref[...], preferred_element_type=jnp.float32) + b_ref[:, 0:s1]
    h = jnp.maximum(h, 0.0)

    h = jnp.dot(h, w2_ref[...], preferred_element_type=jnp.float32) + b_ref[:, s1:s2]
    h = jnp.maximum(h, 0.0)

    h = jnp.dot(h, w3_ref[...], preferred_element_type=jnp.float32) + b_ref[:, s2:s3]
    h = jnp.maximum(h, 0.0)

    h = jnp.dot(h, w4_ref[...], preferred_element_type=jnp.float32) + b_ref[:, s3:s4]
    h = jnp.maximum(h, 0.0)

    o_ref[...] = h


def prepare_params(params):
    """One-time conversion of PyTorch-style params (W: [out, in], b: [out]) into
    pre-transposed, lane-padded kernel operands.  Zero padding keeps the math
    exact; the wrapper slices the padded output back to out_size."""
    prepared = {}
    biases = []
    for i in (1, 2, 3, 4):
        w = params[f"w{i}"].astype(jnp.float32).T          # [in, out]
        b = params[f"b{i}"].astype(jnp.float32)            # [out]
        fan_in, fan_out = w.shape
        pad_in = _round_up(fan_in, LANE)
        pad_out = _round_up(fan_out, LANE)
        prepared[f"w{i}"] = jnp.pad(
            w, ((0, pad_in - fan_in), (0, pad_out - fan_out)))
        biases.append(jnp.pad(b, (0, pad_out - fan_out)))
    prepared["b_all"] = jnp.concatenate(biases)[None, :]   # [1, sum(pad_out)]
    return prepared


def mlp_classifier_forward(x, prepared, out_size, tile_b=256):
    """x: [B, input_size] float32.  prepared: output of prepare_params().
    out_size: true (unpadded) number of output features (static)."""
    B, in_size = x.shape
    w1, w2, w3, w4 = (prepared[f"w{i}"] for i in (1, 2, 3, 4))
    b_all = prepared["b_all"]

    pad_in = w1.shape[0]
    h1, h2, h3, h4 = w1.shape[1], w2.shape[1], w3.shape[1], w4.shape[1]
    splits = (h1, h1 + h2, h1 + h2 + h3, h1 + h2 + h3 + h4)

    # Batch tile: multiple of 8 sublanes, capped at tile_b; pad B up to a
    # multiple of the tile so the grid divides evenly.
    tb = min(tile_b, _round_up(B, SUBLANE))
    b_pad = _round_up(B, tb)

    # Zero-pad activations once (zeros are exact under matmul/ReLU).
    x_p = jnp.pad(x.astype(jnp.float32),
                  ((0, b_pad - B), (0, pad_in - in_size)))

    grid = (b_pad // tb,)
    kernel = functools.partial(_mlp_kernel, splits=splits)

    out_p = pl.pallas_call(
        kernel,
        out_shape=jax.ShapeDtypeStruct((b_pad, h4), jnp.float32),
        grid=grid,
        in_specs=[
            pl.BlockSpec((tb, pad_in), lambda i: (i, 0)),        # x tile (pipelined)
            pl.BlockSpec((pad_in, h1), lambda i: (0, 0)),        # weights: resident
            pl.BlockSpec((h1, h2), lambda i: (0, 0)),
            pl.BlockSpec((h2, h3), lambda i: (0, 0)),
            pl.BlockSpec((h3, h4), lambda i: (0, 0)),
            pl.BlockSpec((1, splits[-1]), lambda i: (0, 0)),     # packed biases
        ],
        out_specs=pl.BlockSpec((tb, h4), lambda i: (i, 0)),
        compiler_params=pltpu.CompilerParams(
            dimension_semantics=("parallel",)),                  # megacore on v7x
    )(x_p, w1, w2, w3, w4, b_all)

    return out_p[:B, :out_size]


def init_params(key, input_size, out_size):
    """PyTorch nn.Linear-style init: W is [out_features, in_features],
    uniform(-1/sqrt(fan_in), 1/sqrt(fan_in))."""
    dims = [(200, input_size), (120, 200), (60, 120), (out_size, 60)]
    params = {}
    for i, (fan_out, fan_in) in enumerate(dims, start=1):
        key, kw, kb = jax.random.split(key, 3)
        bound = 1.0 / jnp.sqrt(fan_in)
        params[f"w{i}"] = jax.random.uniform(
            kw, (fan_out, fan_in), jnp.float32, -bound, bound)
        params[f"b{i}"] = jax.random.uniform(
            kb, (fan_out,), jnp.float32, -bound, bound)
    return params


def _reference_forward(x, params):
    h = x
    for i in (1, 2, 3, 4):
        h = h @ params[f"w{i}"].T + params[f"b{i}"]
        h = jnp.maximum(h, 0.0)   # module applies ReLU after fc4 too
    return h


if __name__ == "__main__":
    key = jax.random.PRNGKey(0)
    batch, input_size, out_size = 2, 32, 10

    k_x, k_p, k_x2 = jax.random.split(key, 3)
    params = init_params(k_p, input_size, out_size)
    prepared = prepare_params(params)

    fwd = jax.jit(mlp_classifier_forward, static_argnums=(2,))

    # Small-batch check (single grid step, tile padded to 8 rows).
    x = jax.random.normal(k_x, (batch, input_size), jnp.float32)
    out = jax.block_until_ready(fwd(x, prepared, out_size))
    ref = _reference_forward(x, params)
    assert out.shape == (batch, out_size)
    assert jnp.allclose(out, ref, atol=1e-4, rtol=1e-4)

    # Multi-tile check (exercises the batch grid + edge padding).
    x2 = jax.random.normal(k_x2, (300, input_size), jnp.float32)
    out2 = jax.block_until_ready(fwd(x2, prepared, out_size))
    ref2 = _reference_forward(x2, params)
    assert out2.shape == (300, out_size)
    assert jnp.allclose(out2, ref2, atol=1e-4, rtol=1e-4)

    print("KERNEL_OK")
</pallas_src>

<mosaic_0001>
module attributes {stable_mosaic.version = 11 : i64} {
  func.func @_mlp_kernel(%arg0: i32, %arg1: memref<8x128xf32, #tpu.memory_space<vmem>>, %arg2: memref<128x256xf32, #tpu.memory_space<vmem>>, %arg3: memref<256x128xf32, #tpu.memory_space<vmem>>, %arg4: memref<128x128xf32, #tpu.memory_space<vmem>>, %arg5: memref<128x128xf32, #tpu.memory_space<vmem>>, %arg6: memref<1x640xf32, #tpu.memory_space<vmem>>, %arg7: memref<8x128xf32, #tpu.memory_space<vmem>>) attributes {dimension_semantics = [#tpu.dimension_semantics<parallel>], iteration_bounds = array<i64: 1>, scalar_prefetch = 0 : i64, scratch_operands = 0 : i64, tpu.core_type = #tpu.core_type<tc>, window_params = [{transform_indices = @transform_0, window_bounds = array<i64: 8, 128>}, {pipeline_mode = #tpu.pipeline_mode<synchronous>, transform_indices = @transform_1, window_bounds = array<i64: 128, 256>}, {pipeline_mode = #tpu.pipeline_mode<synchronous>, transform_indices = @transform_2, window_bounds = array<i64: 256, 128>}, {pipeline_mode = #tpu.pipeline_mode<synchronous>, transform_indices = @transform_3, window_bounds = array<i64: 128, 128>}, {pipeline_mode = #tpu.pipeline_mode<synchronous>, transform_indices = @transform_4, window_bounds = array<i64: 128, 128>}, {pipeline_mode = #tpu.pipeline_mode<synchronous>, transform_indices = @transform_5, window_bounds = array<i64: 1, 640>}, {transform_indices = @transform_6, window_bounds = array<i64: 8, 128>}]} {
    %c0 = arith.constant 0 : index
    %c0_0 = arith.constant 0 : index
    %0 = vector.load %arg1[%c0, %c0_0] : memref<8x128xf32, #tpu.memory_space<vmem>>, vector<8x128xf32>
    %c0_1 = arith.constant 0 : index
    %c0_2 = arith.constant 0 : index
    %1 = vector.load %arg2[%c0_1, %c0_2] : memref<128x256xf32, #tpu.memory_space<vmem>>, vector<128x256xf32>
    %cst = arith.constant dense<0.000000e+00> : vector<8x256xf32>
    %2 = tpu.matmul %0, %1, %cst {dimension_numbers = #tpu.dot_dimension_numbers<[1], [0], [0], [1], [0, 0, 1, 1], [], []>} : vector<8x128xf32>, vector<128x256xf32>, vector<8x256xf32> -> vector<8x256xf32>
    %c0_3 = arith.constant 0 : index
    %c0_4 = arith.constant 0 : index
    %3 = vector.load %arg6[%c0_3, %c0_4] : memref<1x640xf32, #tpu.memory_space<vmem>>, vector<1x256xf32>
    %4 = vector.broadcast %3 : vector<1x256xf32> to vector<8x256xf32>
    %5 = arith.addf %2, %4 : vector<8x256xf32>
    %cst_5 = arith.constant 0.000000e+00 : f32
    %6 = vector.broadcast %cst_5 : f32 to vector<8x256xf32>
    %7 = arith.maximumf %5, %6 : vector<8x256xf32>
    %c0_6 = arith.constant 0 : index
    %c0_7 = arith.constant 0 : index
    %8 = vector.load %arg3[%c0_6, %c0_7] : memref<256x128xf32, #tpu.memory_space<vmem>>, vector<256x128xf32>
    %cst_8 = arith.constant dense<0.000000e+00> : vector<8x128xf32>
    %9 = tpu.matmul %7, %8, %cst_8 {dimension_numbers = #tpu.dot_dimension_numbers<[1], [0], [0], [1], [0, 0, 1, 1], [], []>} : vector<8x256xf32>, vector<256x128xf32>, vector<8x128xf32> -> vector<8x128xf32>
    %c0_9 = arith.constant 0 : index
    %c256 = arith.constant 256 : index
    %10 = vector.load %arg6[%c0_9, %c256] : memref<1x640xf32, #tpu.memory_space<vmem>>, vector<1x128xf32>
    %11 = vector.broadcast %10 : vector<1x128xf32> to vector<8x128xf32>
    %12 = arith.addf %9, %11 : vector<8x128xf32>
    %cst_10 = arith.constant 0.000000e+00 : f32
    %13 = vector.broadcast %cst_10 : f32 to vector<8x128xf32>
    %14 = arith.maximumf %12, %13 : vector<8x128xf32>
    %c0_11 = arith.constant 0 : index
    %c0_12 = arith.constant 0 : index
    %15 = vector.load %arg4[%c0_11, %c0_12] : memref<128x128xf32, #tpu.memory_space<vmem>>, vector<128x128xf32>
    %cst_13 = arith.constant dense<0.000000e+00> : vector<8x128xf32>
    %16 = tpu.matmul %14, %15, %cst_13 {dimension_numbers = #tpu.dot_dimension_numbers<[1], [0], [0], [1], [0, 0, 1, 1], [], []>} : vector<8x128xf32>, vector<128x128xf32>, vector<8x128xf32> -> vector<8x128xf32>
    %c0_14 = arith.constant 0 : index
    %c384 = arith.constant 384 : index
    %17 = vector.load %arg6[%c0_14, %c384] : memref<1x640xf32, #tpu.memory_space<vmem>>, vector<1x128xf32>
    %18 = vector.broadcast %17 : vector<1x128xf32> to vector<8x128xf32>
    %19 = arith.addf %16, %18 : vector<8x128xf32>
    %cst_15 = arith.constant 0.000000e+00 : f32
    %20 = vector.broadcast %cst_15 : f32 to vector<8x128xf32>
    %21 = arith.maximumf %19, %20 : vector<8x128xf32>
    %c0_16 = arith.constant 0 : index
    %c0_17 = arith.constant 0 : index
    %22 = vector.load %arg5[%c0_16, %c0_17] : memref<128x128xf32, #tpu.memory_space<vmem>>, vector<128x128xf32>
    %cst_18 = arith.constant dense<0.000000e+00> : vector<8x128xf32>
    %23 = tpu.matmul %21, %22, %cst_18 {dimension_numbers = #tpu.dot_dimension_numbers<[1], [0], [0], [1], [0, 0, 1, 1], [], []>} : vector<8x128xf32>, vector<128x128xf32>, vector<8x128xf32> -> vector<8x128xf32>
    %c0_19 = arith.constant 0 : index
    %c512 = arith.constant 512 : index
    %24 = vector.load %arg6[%c0_19, %c512] : memref<1x640xf32, #tpu.memory_space<vmem>>, vector<1x128xf32>
    %25 = vector.broadcast %24 : vector<1x128xf32> to vector<8x128xf32>
    %26 = arith.addf %23, %25 : vector<8x128xf32>
    %cst_20 = arith.constant 0.000000e+00 : f32
    %27 = vector.broadcast %cst_20 : f32 to vector<8x128xf32>
    %28 = arith.maximumf %26, %27 : vector<8x128xf32>
    %c0_21 = arith.constant 0 : index
    %c0_22 = arith.constant 0 : index
    %29 = vector.load %arg7[%c0_21, %c0_22] : memref<8x128xf32, #tpu.memory_space<vmem>>, vector<8x128xf32>
    tpu.vector_store %arg7[%c0_21, %c0_22], %28 {strides = array<i32>} : memref<8x128xf32, #tpu.memory_space<vmem>>, vector<8x128xf32>,
    return
  }
  func.func @transform_0(%arg0: i32) -> (i32, i32) {
    %c0_i32 = arith.constant 0 : i32
    %c0_i32_0 = arith.constant 0 : i32
    return %arg0, %c0_i32 : i32, i32
  }
  func.func @transform_1(%arg0: i32) -> (i32, i32) {
    %c0_i32 = arith.constant 0 : i32
    %c0_i32_0 = arith.constant 0 : i32
    %c0_i32_1 = arith.constant 0 : i32
    return %c0_i32, %c0_i32_0 : i32, i32
  }
  func.func @transform_2(%arg0: i32) -> (i32, i32) {
    %c0_i32 = arith.constant 0 : i32
    %c0_i32_0 = arith.constant 0 : i32
    %c0_i32_1 = arith.constant 0 : i32
    return %c0_i32, %c0_i32_0 : i32, i32
  }
  func.func @transform_3(%arg0: i32) -> (i32, i32) {
    %c0_i32 = arith.constant 0 : i32
    %c0_i32_0 = arith.constant 0 : i32
    %c0_i32_1 = arith.constant 0 : i32
    return %c0_i32, %c0_i32_0 : i32, i32
  }
  func.func @transform_4(%arg0: i32) -> (i32, i32) {
    %c0_i32 = arith.constant 0 : i32
    %c0_i32_0 = arith.constant 0 : i32
    %c0_i32_1 = arith.constant 0 : i32
    return %c0_i32, %c0_i32_0 : i32, i32
  }
  func.func @transform_5(%arg0: i32) -> (i32, i32) {
    %c0_i32 = arith.constant 0 : i32
    %c0_i32_0 = arith.constant 0 : i32
    %c0_i32_1 = arith.constant 0 : i32
    return %c0_i32, %c0_i32_0 : i32, i32
  }
  func.func @transform_6(%arg0: i32) -> (i32, i32) {
    %c0_i32 = arith.constant 0 : i32
    %c0_i32_0 = arith.constant 0 : i32
    return %arg0, %c0_i32 : i32, i32
  }
}

</mosaic_0001>

<bundles_post_ra>
// kernel: mlp_classifier_forward.1
= control target key start
LH: loop header
LB: loop body
LE: loop exit
PB: predicated region body
PF: predicated region fallthrough
CT: control target
= control target key end

     0   :  { %11 = vsyncpa [#allocation3], 0  ;;  %s520_s0 = inlined_call_operand.vmem [shape: f32[8,128], index: 0, kind: input, shape index: {}]   ;;  %s521_s1 = inlined_call_operand.hbm [shape: f32[128,256], index: 1, kind: input, shape index: {}]   ;;  %s522_s2 = inlined_call_operand.hbm [shape: f32[256,128], index: 2, kind: input, shape index: {}]   ;;  %s523_s3 = inlined_call_operand.hbm [shape: f32[128,128], index: 3, kind: input, shape index: {}]   ;;  %s524_s4 = inlined_call_operand.hbm [shape: f32[128,128], index: 4, kind: input, shape index: {}]   ;;  %s525_s5 = inlined_call_operand.vmem [shape: f32[1,640], index: 5, kind: input, shape index: {}]   ;;  %s526_s6 = inlined_call_operand.vmem [shape: f32[8,128], index: 6, kind: output, shape index: {}]  }
   0x1   :  { %12 = vsyncpa [#allocation5], 0  ;;  %s33_s23 = sshll.u32 %s522_s2, 4  ;;  %s34_s23 = int_to_ptr.hbm [resolvable:$true] %s33_s23 }
   0x2   :  { %13 = vsyncpa [#allocation8], 0  ;;  %s447_s24 = smov [#allocation4]   ;;  %s20_s28 = sshll.u32 %s521_s1, 4  ;;  %s21_s28 = int_to_ptr.hbm [resolvable:$true] %s20_s28 }
   0x3   :  { %s35_s25 = sshll.u32 %s447_s24, 4  ;;  %s448_s29 = smov 128   ;;  %s36_s25 = int_to_ptr.vmem [resolvable:$true] %s35_s25 }
   0x4   :  { %s449_s30 = smov 8   ;;  %s450_s7 = smov [#allocation2]  }
   0x5   :  { %41 = dma.hbm_to_vmem [thread:$0]  %s34_s23, 4096, %s36_s25, [#allocation5], %s448_s29, %s448_s29, %s449_s30  }
   0x6   :  { %s22_s8 = sshll.u32 %s450_s7, 4  ;;  %s451_s9 = smov 256   ;;  %s23_s8 = int_to_ptr.vmem [resolvable:$true] %s22_s8 }
   0x7   :  { %s452_s10 = smov 16   ;;  %s46_s12 = sshll.u32 %s523_s3, 4  ;;  %s47_s12 = int_to_ptr.hbm [resolvable:$true] %s46_s12 }
   0x8   :  { %28 = dma.hbm_to_vmem [thread:$0]  %s21_s28, 4096, %s23_s8, [#allocation3], %s451_s9, %s451_s9, %s452_s10  }
   0x9   :  { %s453_s13 = smov [#allocation6]   ;;  %s59_s16 = sshll.u32 %s524_s4, 4  ;;  %s60_s16 = int_to_ptr.hbm [resolvable:$true] %s59_s16 }
   0xa   :  { %s48_s14 = sshll.u32 %s453_s13, 4  ;;  %s454_s17 = smov [#allocation7]   ;;  %s49_s14 = int_to_ptr.vmem [resolvable:$true] %s48_s14 }
   0xb   :  { %54 = dma.hbm_to_vmem [thread:$0]  %s47_s12, 2048, %s49_s14, [#allocation5], %s448_s29, %s448_s29, %s449_s30  }
   0xc   :  { %s61_s18 = sshll.u32 %s454_s17, 4  ;;  %s62_s18 = int_to_ptr.vmem [resolvable:$true] %s61_s18 }
   0xd   :  { %67 = dma.hbm_to_vmem [thread:$0]  %s60_s16, 2048, %s62_s18, [#allocation8], %s448_s29, %s448_s29, %s449_s30  }
   0xe   :  { %441 = dma.done.wait [#allocation3], 4096  }
   0xf   :  { %442 = vsyncadd [#allocation3], 4294963200 }
  0x10   :  { %443 = dma.done.wait [#allocation5], 6144  }
  0x11   :  { %444 = vsyncadd [#allocation5], 4294961152 }
  0x12   :  { %445 = dma.done.wait [#allocation8], 2048  }
  0x13   :  { %446 = vsyncadd [#allocation8], 4294965248  ;;  %v117_v0 = vld [vmem:[#allocation2 + $0xf0] sm:$0xff]  ;;  %v115_v1 = vld [vmem:[#allocation2 + $0xe0] sm:$0xff] }
  0x14   :  { %v118_v2 = vld [vmem:[#allocation2 + $0xf8] sm:$0xff]  ;;  %125 = vmatpush.msra.mxu0 %v117_v0  ;;  %v116_v3 = vld [vmem:[#allocation2 + $0xe8] sm:$0xff]  ;;  %v113_v4 = vld [vmem:[#allocation2 + $0xd0] sm:$0xff] }
  0x15   :  { %145 = vmatpush.msra.mxu1 %v118_v2  ;;  %v114_v5 = vld [vmem:[#allocation2 + $0xd8] sm:$0xff]  ;;  %v111_v6 = vld [vmem:[#allocation2 + $0xc0] sm:$0xff]  ;;  %v112_v7 = vld [vmem:[#allocation2 + $0xc8] sm:$0xff] }
  0x16   :  { %126 = vmatpush.msra.mxu0 %v115_v1  ;;  %v109_v8 = vld [vmem:[#allocation2 + $0xb0] sm:$0xff]  ;;  %v110_v9 = vld [vmem:[#allocation2 + $0xb8] sm:$0xff]  ;;  %v107_v10 = vld [vmem:[#allocation2 + $0xa0] sm:$0xff] }
  0x17   :  { %146 = vmatpush.msra.mxu1 %v116_v3  ;;  %v108_v11 = vld [vmem:[#allocation2 + $0xa8] sm:$0xff]  ;;  %v105_v12 = vld [vmem:[#allocation2 + $0x90] sm:$0xff]  ;;  %v106_v13 = vld [vmem:[#allocation2 + $0x98] sm:$0xff] }
  0x18   :  { %127 = vmatpush.msra.mxu0 %v113_v4  ;;  %v182_v14 = vld [vmem:[#allocation4 + $0x78] sm:$0xff]  ;;  %v181_v15 = vld [vmem:[#allocation4 + $0x70] sm:$0xff]  ;;  %v103_v17 = vld [vmem:[#allocation2 + $0x80] sm:$0xff] }
  0x19   :  { %147 = vmatpush.msra.mxu1 %v114_v5  ;;  %v198_v16 = vld [vmem:[#allocation4 + $0xf8] sm:$0xff]  ;;  %v104_v18 = vld [vmem:[#allocation2 + $0x88] sm:$0xff]  ;;  %203 = vmatpush.msra.mxu2 %v182_v14  ;;  %v197_v19 = vld [vmem:[#allocation4 + $0xf0] sm:$0xff] }
  0x1a   :  { %128 = vmatpush.msra.mxu0 %v111_v6  ;;  %223 = vmatpush.msra.mxu3 %v198_v16  ;;  %v180_v20 = vld [vmem:[#allocation4 + $0x68] sm:$0xff]  ;;  %v101_v22 = vld [vmem:[#allocation2 + $0x70] sm:$0xff]  ;;  %v102_v23 = vld [vmem:[#allocation2 + $0x78] sm:$0xff] }
  0x1b   :  { %148 = vmatpush.msra.mxu1 %v112_v7  ;;  %v196_v21 = vld [vmem:[#allocation4 + $0xe8] sm:$0xff]  ;;  %204 = vmatpush.msra.mxu2 %v181_v15  ;;  %v179_v24 = vld [vmem:[#allocation4 + $0x60] sm:$0xff]  ;;  %v178_v28 = vld [vmem:[#allocation4 + $0x58] sm:$0xff] }
  0x1c   :  { %129 = vmatpush.msra.mxu0 %v109_v8  ;;  %224 = vmatpush.msra.mxu3 %v197_v19  ;;  %v195_v25 = vld [vmem:[#allocation4 + $0xe0] sm:$0xff]  ;;  %v100_v27 = vld [vmem:[#allocation2 + $0x68] sm:$0xff]  ;;  %v194_v29 = vld [vmem:[#allocation4 + $0xd8] sm:$0xff] }
  0x1d   :  { %149 = vmatpush.msra.mxu1 %v110_v9  ;;  %v99_v26 = vld [vmem:[#allocation2 + $0x60] sm:$0xff]  ;;  %205 = vmatpush.msra.mxu2 %v180_v20  ;;  %v97_v30 = vld [vmem:[#allocation2 + $0x50] sm:$0xff]  ;;  %v98_v32 = vld [vmem:[#allocation2 + $0x58] sm:$0xff] }
  0x1e   :  { %130 = vmatpush.msra.mxu0 %v107_v10  ;;  %225 = vmatpush.msra.mxu3 %v196_v21  ;;  %v95_v31 = vld [vmem:[#allocation2 + $0x40] sm:$0xff]  ;;  %v177_v33 = vld [vmem:[#allocation4 + $0x50] sm:$0xff]  ;;  %v96_v35 = vld [vmem:[#allocation2 + $0x48] sm:$0xff] }
  0x1f   :  { %150 = vmatpush.msra.mxu1 %v108_v11  ;;  %206 = vmatpush.msra.mxu2 %v179_v24  ;;  %v193_v34 = vld [vmem:[#allocation4 + $0xd0] sm:$0xff]  ;;  %v176_v36 = vld [vmem:[#allocation4 + $0x48] sm:$0xff]  ;;  %v94_v39 = vld [vmem:[#allocation2 + $0x38] sm:$0xff] }
  0x20   :  { %131 = vmatpush.msra.mxu0 %v105_v12  ;;  %226 = vmatpush.msra.mxu3 %v195_v25  ;;  %v192_v37 = vld [vmem:[#allocation4 + $0xc8] sm:$0xff]  ;;  %v93_v38 = vld [vmem:[#allocation2 + $0x30] sm:$0xff]  ;;  %v175_v40 = vld [vmem:[#allocation4 + $0x40] sm:$0xff] }
  0x21   :  { %151 = vmatpush.msra.mxu1 %v106_v13  ;;  %207 = vmatpush.msra.mxu2 %v178_v28  ;;  %v191_v41 = vld [vmem:[#allocation4 + $0xc0] sm:$0xff]  ;;  %v92_v43 = vld [vmem:[#allocation2 + $0x28] sm:$0xff]  ;;  %v174_v44 = vld [vmem:[#allocation4 + $0x38] sm:$0xff] }
  0x22   :  { %132 = vmatpush.msra.mxu0 %v103_v17  ;;  %227 = vmatpush.msra.mxu3 %v194_v29  ;;  %v91_v42 = vld [vmem:[#allocation2 + $0x20] sm:$0xff]  ;;  %v190_v45 = vld [vmem:[#allocation4 + $0xb8] sm:$0xff]  ;;  %v89_v46 = vld [vmem:[#allocation2 + $0x10] sm:$0xff] }
  0x23   :  { %152 = vmatpush.msra.mxu1 %v104_v18  ;;  %208 = vmatpush.msra.mxu2 %v177_v33  ;;  %v90_v47 = vld [vmem:[#allocation2 + $0x18] sm:$0xff]  ;;  %v173_v48 = vld [vmem:[#allocation4 + $0x30] sm:$0xff]  ;;  %v87_v50 = vld [vmem:[#allocation2] sm:$0xff] }
  0x24   :  { %133 = vmatpush.msra.mxu0 %v101_v22  ;;  %228 = vmatpush.msra.mxu3 %v193_v34  ;;  %v189_v49 = vld [vmem:[#allocation4 + $0xb0] sm:$0xff]  ;;  %v88_v51 = vld [vmem:[#allocation2 + $0x8] sm:$0xff]  ;;  %v86_v52 = vld [vmem:[%s520_s0] sm:$0xff] }
  0x25   :  { %153 = vmatpush.msra.mxu1 %v102_v23  ;;  %209 = vmatpush.msra.mxu2 %v176_v36  ;;  %v172_v53 = vld [vmem:[#allocation4 + $0x28] sm:$0xff]  ;;  %v171_v55 = vld [vmem:[#allocation4 + $0x20] sm:$0xff]  ;;  %v170_v57 = vld [vmem:[#allocation4 + $0x18] sm:$0xff] }
  0x26   :  { %134 = vmatpush.msra.mxu0 %v99_v26  ;;  %229 = vmatpush.msra.mxu3 %v192_v37  ;;  %v188_v54 = vld [vmem:[#allocation4 + $0xa8] sm:$0xff]  ;;  %v187_v56 = vld [vmem:[#allocation4 + $0xa0] sm:$0xff]  ;;  %v169_v58 = vld [vmem:[#allocation4 + $0x10] sm:$0xff] }
  0x27   :  { %154 = vmatpush.msra.mxu1 %v100_v27  ;;  %210 = vmatpush.msra.mxu2 %v175_v40  ;;  %v186_v59 = vld [vmem:[#allocation4 + $0x98] sm:$0xff]  ;;  %v168_v60 = vld [vmem:[#allocation4 + $0x8] sm:$0xff]  ;;  %v185_v61 = vld [vmem:[#allocation4 + $0x90] sm:$0xff] }
  0x28   :  { %135 = vmatpush.msra.mxu0 %v97_v30  ;;  %230 = vmatpush.msra.mxu3 %v191_v41  ;;  %v167_v62 = vld [vmem:[#allocation4] sm:$0xff]  ;;  %v184_v63 = vld [vmem:[#allocation4 + $0x88] sm:$0xff]  ;;  %v259_v1 = vld [vmem:[#allocation6 + $0x78] sm:$0xff] }
  0x29   :  { %155 = vmatpush.msra.mxu1 %v98_v32  ;;  %211 = vmatpush.msra.mxu2 %v174_v44  ;;  %v183_v0 = vld [vmem:[#allocation4 + $0x80] sm:$0xff]  ;;  %v258_v2 = vld [vmem:[#allocation6 + $0x70] sm:$0xff]  ;;  %v257_v3 = vld [vmem:[#allocation6 + $0x68] sm:$0xff] }
  0x2a   :  { %136 = vmatpush.msra.mxu0 %v95_v31  ;;  %231 = vmatpush.msra.mxu3 %v190_v45  ;;  %v256_v4 = vld [vmem:[#allocation6 + $0x60] sm:$0xff]  ;;  %v255_v5 = vld [vmem:[#allocation6 + $0x58] sm:$0xff]  ;;  %v254_v6 = vld [vmem:[#allocation6 + $0x50] sm:$0xff] }
  0x2b   :  { %156 = vmatpush.msra.mxu1 %v96_v35  ;;  %212 = vmatpush.msra.mxu2 %v173_v48  ;;  %v253_v7 = vld [vmem:[#allocation6 + $0x48] sm:$0xff]  ;;  %v252_v8 = vld [vmem:[#allocation6 + $0x40] sm:$0xff]  ;;  %v251_v9 = vld [vmem:[#allocation6 + $0x38] sm:$0xff] }
  0x2c   :  { %137 = vmatpush.msra.mxu0 %v93_v38  ;;  %232 = vmatpush.msra.mxu3 %v189_v49  ;;  %v250_v10 = vld [vmem:[#allocation6 + $0x30] sm:$0xff]  ;;  %v249_v11 = vld [vmem:[#allocation6 + $0x28] sm:$0xff]  ;;  %v248_v12 = vld [vmem:[#allocation6 + $0x20] sm:$0xff] }
  0x2d   :  { %157 = vmatpush.msra.mxu1 %v94_v39  ;;  %213 = vmatpush.msra.mxu2 %v172_v53  ;;  %v119_v13 = vld [vmem:[%s525_s5] sm:$0x3]  ;;  %v247_v22 = vld [vmem:[#allocation6 + $0x18] sm:$0xff]  ;;  %v246_v23 = vld [vmem:[#allocation6 + $0x10] sm:$0xff] }
  0x2e   :  { %138 = vmatpush.msra.mxu0 %v91_v42  ;;  %233 = vmatpush.msra.mxu3 %v188_v54  ;;  %v121_v14 = vperm.slane %v119_v13, 0  ;;  %v122_v15 = vperm.slane %v119_v13, 1  ;;  %v245_v24 = vld [vmem:[#allocation6 + $0x8] sm:$0xff]  ;;  %v244_v25 = vld [vmem:[#allocation6] sm:$0xff]  ;;  %v300_v26 = vld [vmem:[#allocation7 + $0x78] sm:$0xff] }
  0x2f   :  { %158 = vmatpush.msra.mxu1 %v92_v43  ;;  %214 = vmatpush.msra.mxu2 %v171_v55  ;;  %v299_v27 = vld [vmem:[#allocation7 + $0x70] sm:$0xff]  ;;  %v298_v28 = vld [vmem:[#allocation7 + $0x68] sm:$0xff]  ;;  %v297_v29 = vld [vmem:[#allocation7 + $0x60] sm:$0xff] }
  0x30   :  { %139 = vmatpush.msra.mxu0 %v89_v46  ;;  %234 = vmatpush.msra.mxu3 %v187_v56  ;;  %v296_v30 = vld [vmem:[#allocation7 + $0x58] sm:$0xff]  ;;  %v295_v31 = vld [vmem:[#allocation7 + $0x50] sm:$0xff]  ;;  %v294_v32 = vld [vmem:[#allocation7 + $0x48] sm:$0xff] }
  0x31   :  { %159 = vmatpush.msra.mxu1 %v90_v47  ;;  %215 = vmatpush.msra.mxu2 %v170_v57  ;;  %v293_v33 = vld [vmem:[#allocation7 + $0x40] sm:$0xff]  ;;  %v292_v34 = vld [vmem:[#allocation7 + $0x38] sm:$0xff]  ;;  %v291_v35 = vld [vmem:[#allocation7 + $0x30] sm:$0xff] }
  0x32   :  { %140 = vmatpush.msra.mxu0 %v87_v50  ;;  %235 = vmatpush.msra.mxu3 %v186_v59  ;;  %v290_v36 = vld [vmem:[#allocation7 + $0x28] sm:$0xff]  ;;  %v289_v37 = vld [vmem:[#allocation7 + $0x20] sm:$0xff]  ;;  %v288_v39 = vld [vmem:[#allocation7 + $0x18] sm:$0xff] }
  0x33   :  { %160 = vmatpush.msra.mxu1 %v88_v51  ;;  %141 = vmatmul.f32.vlgmr.msra.gmra.mxu0 %v86_v52  ;;  %v342_v38 = vld [vmem:[%s525_s5 + $0x2] ss:$0 sm:$0xff]  ;;  %v287_v45 = vld [vmem:[#allocation7 + $0x10] sm:$0xff]  ;;  %v286_v46 = vld [vmem:[#allocation7 + $0x8] sm:$0xff] }
  0x34   :  { %161 = vmatmul.f32.vlgmr.msra.gmra.mxu1 %v86_v52  ;;  %216 = vmatpush.msra.mxu2 %v169_v58  ;;  %v285_v47 = vld [vmem:[#allocation7] sm:$0xff] }
  0x35   :  { %236 = vmatpush.msra.mxu3 %v185_v61  ;;  %264 = vmatpush.msrb.mxu0 %v259_v1  ;;  %v343_v48 = vld [vmem:[%s525_s5 + $0x3] ss:$0 sm:$0xff]  ;;  %v344_v52 = vld [vmem:[%s525_s5 + $0x4] ss:$0 sm:$0xff] }
  0x36   :  { %217 = vmatpush.msra.mxu2 %v168_v60  ;;  %305 = vmatpush.msrb.mxu1 %v300_v26 }
  0x37   :  { %237 = vmatpush.msra.mxu3 %v184_v63  ;;  %265 = vmatpush.msrb.mxu0 %v258_v2 }
  0x38   :  { %218 = vmatpush.msra.mxu2 %v167_v62  ;;  %306 = vmatpush.msrb.mxu1 %v299_v27 }
  0x39   :  { %238 = vmatpush.msra.mxu3 %v183_v0  ;;  %266 = vmatpush.msrb.mxu0 %v257_v3 }
  0x3a   :  { %307 = vmatpush.msrb.mxu1 %v298_v28 }
  0x3b   :  { %267 = vmatpush.msrb.mxu0 %v256_v4 }
  0x3c   :  { %308 = vmatpush.msrb.mxu1 %v297_v29 }
  0x3d   :  { %268 = vmatpush.msrb.mxu0 %v255_v5 }
  0x3e   :  { %309 = vmatpush.msrb.mxu1 %v296_v30 }
  0x3f   :  { %269 = vmatpush.msrb.mxu0 %v254_v6 }
  0x40   :  { %310 = vmatpush.msrb.mxu1 %v295_v31 }
  0x41   :  { %270 = vmatpush.msrb.mxu0 %v253_v7 }
  0x42   :  { %311 = vmatpush.msrb.mxu1 %v294_v32 }
  0x43   :  { %271 = vmatpush.msrb.mxu0 %v252_v8 }
  0x44   :  { %312 = vmatpush.msrb.mxu1 %v293_v33 }
  0x45   :  { %272 = vmatpush.msrb.mxu0 %v251_v9 }
  0x46   :  { %313 = vmatpush.msrb.mxu1 %v292_v34 }
  0x47   :  { %273 = vmatpush.msrb.mxu0 %v250_v10 }
  0x48   :  { %314 = vmatpush.msrb.mxu1 %v291_v35 }
  0x49   :  { %274 = vmatpush.msrb.mxu0 %v249_v11 }
  0x4a   :  { %315 = vmatpush.msrb.mxu1 %v290_v36 }
  0x4b   :  { %275 = vmatpush.msrb.mxu0 %v248_v12 }
  0x4c   :  { %316 = vmatpush.msrb.mxu1 %v289_v37 }
  0x4d   :  { %276 = vmatpush.msrb.mxu0 %v247_v22 }
  0x4e   :  { %317 = vmatpush.msrb.mxu1 %v288_v39 }
  0x4f   :  { %277 = vmatpush.msrb.mxu0 %v246_v23 }
  0x50   :  { %318 = vmatpush.msrb.mxu1 %v287_v45 }
  0x51   :  { %278 = vmatpush.msrb.mxu0 %v245_v24 }
  0x52   :  { %319 = vmatpush.msrb.mxu1 %v286_v46 }
  0x53   :  { %279 = vmatpush.msrb.mxu0 %v244_v25 }
  0x54   :  { %320 = vmatpush.msrb.mxu1 %v285_v47 }
  0xb0   :  { %v142_v16 = vpop.f32.mrf.mxu0 }
  0xb1   :  { %v162_v17 = vpop.f32.mrf.mxu1  ;;  %v143_v18 = vadd.f32 %v142_v16, %v121_v14 }
  0xb2   :  { %v163_v19 = vadd.f32 %v162_v17, %v122_v15 }
  0xb3   :  { %v165_v20 = vmax.f32 %v143_v18, 0.0 }
  0xb4   :  { %v166_v21 = vmax.f32 %v163_v19, 0.0 }
  0xb5   :  { %219 = vmatmul.f32.vlgmr.msra.gmra.mxu2 %v165_v20 }
  0xb6   :  { %239 = vmatmul.f32.vlgmr.msra.gmra.mxu3 %v166_v21 }
 0x138   :  { %v220_v40 = vpop.f32.mrf.mxu2 }
 0x139   :  { %v240_v41 = vpop.f32.mrf.mxu3  ;;  %v221_v42 = vadd.f32 %v342_v38, %v220_v40 }
 0x13b   :  { %v241_v43 = vadd.f32 %v240_v41, %v221_v42 }
 0x13d   :  { %v243_v44 = vmax.f32 %v241_v43, 0.0 }
 0x13f   :  { %280 = vmatmul.f32.vlgmr.msrb.gmra.mxu0 %v243_v44 }
 0x1bc   :  { %v281_v49 = vpop.f32.mrf.mxu0 }
 0x1bd   :  { %v282_v50 = vadd.f32 %v343_v48, %v281_v49 }
 0x1bf   :  { %v284_v51 = vmax.f32 %v282_v50, 0.0 }
 0x1c1   :  { %321 = vmatmul.f32.vlgmr.msrb.gmra.mxu1 %v284_v51 }
 0x23e   :  { %v322_v53 = vpop.f32.mrf.mxu1 }
 0x23f   :  { %v323_v54 = vadd.f32 %v344_v52, %v322_v53 }
 0x241   :  { %v325_v55 = vmax.f32 %v323_v54, 0.0 }
 0x243   :  { %326 = vst [vmem:[%s526_s6] sm:$0xff] %v325_v55 }
 0x244   :  { %331 = vsyncpa [#allocation3], 1 }
 0x245   :  { %332 = vsyncpa [#allocation5], 1 }
 0x246   :  { %333 = vsyncpa [#allocation8], 1 }

</bundles_post_ra>
